<compile_context>
chip_gen: v7x
topology: tpu7x:2x2x1
jax: 0.10.0
libtpu: 0.0.40
codegen_flags: <defaults>
</compile_context>

<pallas_src>
import functools

import jax
import jax.numpy as jnp
import numpy as np
from jax.experimental import pallas as pl
from jax.experimental.pallas import tpu as pltpu

EPS = 1e-5
PAD = 1  # padding=1 (module default)


def _border_masks(H, W):
    """Row/col validity masks, shape (1, H*W) bool, for zero padding = 1.

    Row validity depends only on dy and column validity only on dx, so 4
    masks replace the 9 per-tap masks (the center tap needs none).
    """
    HW = H * W
    pos = jax.lax.broadcasted_iota(jnp.int32, (1, HW), 1)
    if W & (W - 1) == 0:            # power-of-two width: cheap bitwise column index
        col = pos & (W - 1)
    else:
        col = pos % W
    row_ok = {-1: pos >= W,             # source row y-1 exists
              +1: pos < (H - 1) * W}    # source row y+1 exists
    col_ok = {-1: col >= 1,             # source col x-1 exists
              +1: col < (W - 1)}        # source col x+1 exists
    return row_ok, col_ok


def _conv_stage(xs, w, row_ok, col_ok, W):
    """3x3 conv (stride 1, padding 1) on per-image (C, H*W) f32 slabs.

    xs: list of (C, HW) f32 arrays (one per image).
    w:  (Co, 9*C) bf16, column index = tap*C + c, taps ordered (dy, dx) in
        row-major (-1..1, -1..1) order (matches an HWIO (3,3,C,Co) reshape).
    Returns a list of per-image (Co, HW) f32 conv outputs.

    Each tap = static lane rotation (XLU slot) + border-mask select (VPU).
    All 9 taps are stacked along sublanes, cast to bf16 once, and hit the MXU
    in a single matmul with f32 accumulation.
    NOTE(v6e/v7x): doing the roll/mask loop in bf16 (cast x once before the
    loop) would halve the tap vreg footprint; kept in f32 here since v5e has
    no bf16 VALU/XLU path and f32 is the safest lowering on all chips.
    """
    C, HW = xs[0].shape
    # Pre-broadcast the 4 masks to the operand shape once per conv stage
    # (JAX does not CSE broadcast_in_dim).
    rm = {dy: jnp.broadcast_to(row_ok[dy], (C, HW)) for dy in (-1, 1)}
    cm = {dx: jnp.broadcast_to(col_ok[dx], (C, HW)) for dx in (-1, 1)}

    outs = []
    for x in xs:
        taps = []
        for dy in (-1, 0, 1):
            if dy == 0:
                xr = x
            else:
                xr = jnp.where(rm[dy],
                               pltpu.roll(x, (-dy * W) % HW, axis=1), 0.0)
            for dx in (-1, 0, 1):
                if dx == 0:
                    t = xr
                else:
                    t = jnp.where(cm[dx],
                                  pltpu.roll(xr, (-dx) % HW, axis=1), 0.0)
                taps.append(t)
        stacked = jnp.concatenate(taps, axis=0).astype(jnp.bfloat16)  # (9*C, HW)
        outs.append(jnp.dot(w, stacked,
                            preferred_element_type=jnp.float32))      # (Co, HW) f32
    return outs


def _bn_relu(ys, g, b):
    """Training-mode BatchNorm2d + ReLU over per-image (Co, HW) f32 slabs.

    Two-pass biased batch statistics over (N, H, W), eps = 1e-5, affine.
    """
    cnt = float(len(ys) * ys[0].shape[1])
    mean = sum(jnp.sum(y, axis=1, keepdims=True) for y in ys) / cnt        # (Co, 1)
    var = sum(jnp.sum((y - mean) ** 2, axis=1, keepdims=True)
              for y in ys) / cnt                                           # (Co, 1)
    scale = g * jax.lax.rsqrt(var + EPS)
    shift = b - mean * scale
    return [jnp.maximum(y * scale + shift, 0.0) for y in ys]


def double_conv_kernel(x_ref, w1_ref, g1_ref, b1_ref, w2_ref, g2_ref, b2_ref,
                       out_ref, *, H, W):
    N = x_ref.shape[0]
    row_ok, col_ok = _border_masks(H, W)          # built once, reused by both convs

    xs = [x_ref[n] for n in range(N)]             # per-image (Ci, HW) f32 loads
    y1 = _bn_relu(_conv_stage(xs, w1_ref[...], row_ok, col_ok, W),
                  g1_ref[...], b1_ref[...])
    y2 = _bn_relu(_conv_stage(y1, w2_ref[...], row_ok, col_ok, W),
                  g2_ref[...], b2_ref[...])
    for n in range(N):                            # lane-dense (Co, HW) stores
        out_ref[n] = y2[n].astype(out_ref.dtype)


def double_conv(x_nchw, w1, g1, b1, w2, g2, b2):
    """x_nchw: (N, Cin, H, W) f32; w*: (3, 3, Ci, Co) HWIO; g*, b*: (1, Co)."""
    N, Ci, H, W = x_nchw.shape
    Co = w1.shape[-1]
    HW = H * W

    # Activations: free reshapes only, no HBM transpose pass.
    x = x_nchw.reshape(N, Ci, HW)
    # Weights: pre-stack taps*channels on the contraction axis and pre-cast to
    # bf16 once (tiny arrays; done outside the kernel).
    w1s = jnp.transpose(w1.reshape(9 * Ci, Co)).astype(jnp.bfloat16)   # (Co, 9*Ci)
    w2s = jnp.transpose(w2.reshape(9 * Co, Co)).astype(jnp.bfloat16)   # (Co, 9*Co)
    g1c, b1c = g1.reshape(Co, 1), b1.reshape(Co, 1)
    g2c, b2c = g2.reshape(Co, 1), b2.reshape(Co, 1)

    def vmem():
        return pl.BlockSpec(memory_space=pltpu.MemorySpace.VMEM)

    # Gridless call: full arrays resident in VMEM, no 1-step pipeline /
    # double-buffering machinery for this single-block problem.
    out = pl.pallas_call(
        functools.partial(double_conv_kernel, H=H, W=W),
        out_shape=jax.ShapeDtypeStruct((N, Co, HW), jnp.float32),
        in_specs=[vmem() for _ in range(7)],
        out_specs=vmem(),
    )(x, w1s, g1c, b1c, w2s, g2c, b2c)

    return out.reshape(N, Co, H, W)               # free reshape back to NCHW


def double_conv_ref(x_nchw, w1, g1, b1, w2, g2, b2):
    """Pure-JAX f32 reference (same training-mode BN semantics)."""
    def conv(x, w):
        return jax.lax.conv_general_dilated(
            x, w, window_strides=(1, 1), padding=((PAD, PAD), (PAD, PAD)),
            dimension_numbers=('NHWC', 'HWIO', 'NHWC'))

    def bn_relu(y, g, b):
        m = jnp.mean(y, axis=(0, 1, 2), keepdims=True)
        v = jnp.mean((y - m) ** 2, axis=(0, 1, 2), keepdims=True)
        y = (y - m) * jax.lax.rsqrt(v + EPS)
        y = y * g.reshape(1, 1, 1, -1) + b.reshape(1, 1, 1, -1)
        return jnp.maximum(y, 0.0)

    x = jnp.transpose(x_nchw, (0, 2, 3, 1))
    y = bn_relu(conv(x, w1), g1, b1)
    y = bn_relu(conv(y, w2), g2, b2)
    return jnp.transpose(y, (0, 3, 1, 2))


if __name__ == "__main__":
    N, Cin, Cout, H, W = 2, 4, 8, 16, 16

    key = jax.random.PRNGKey(0)
    kx, kw1, kw2, kg1, kb1, kg2, kb2 = jax.random.split(key, 7)

    x = jax.random.normal(kx, (N, Cin, H, W), jnp.float32)
    # Conv2d weights stored HWIO (PyTorch stores OIHW; no bias in the module).
    w1 = jax.random.normal(kw1, (3, 3, Cin, Cout), jnp.float32) * 0.2
    w2 = jax.random.normal(kw2, (3, 3, Cout, Cout), jnp.float32) * 0.2
    # BatchNorm affine params (PyTorch default gamma=1, beta=0; perturb a bit).
    g1 = 1.0 + 0.1 * jax.random.normal(kg1, (1, Cout), jnp.float32)
    b1 = 0.1 * jax.random.normal(kb1, (1, Cout), jnp.float32)
    g2 = 1.0 + 0.1 * jax.random.normal(kg2, (1, Cout), jnp.float32)
    b2 = 0.1 * jax.random.normal(kb2, (1, Cout), jnp.float32)

    out = jax.block_until_ready(double_conv(x, w1, g1, b1, w2, g2, b2))
    ref = jax.block_until_ready(double_conv_ref(x, w1, g1, b1, w2, g2, b2))

    assert out.shape == (N, Cout, H, W), out.shape
    # Tolerance reflects bf16 MXU operands; accumulation and BN/ReLU are f32.
    np.testing.assert_allclose(np.asarray(out), np.asarray(ref),
                               rtol=3e-2, atol=3e-2)
    print("KERNEL_OK")
</pallas_src>

<mosaic_0001>
module attributes {stable_mosaic.version = 11 : i64} {
  func.func @double_conv_kernel(%arg0: memref<2x4x256xf32, #tpu.memory_space<vmem>>, %arg1: memref<8x36xbf16, #tpu.memory_space<vmem>>, %arg2: memref<8x1xf32, #tpu.memory_space<vmem>>, %arg3: memref<8x1xf32, #tpu.memory_space<vmem>>, %arg4: memref<8x72xbf16, #tpu.memory_space<vmem>>, %arg5: memref<8x1xf32, #tpu.memory_space<vmem>>, %arg6: memref<8x1xf32, #tpu.memory_space<vmem>>, %arg7: memref<2x8x256xf32, #tpu.memory_space<vmem>>) attributes {dimension_semantics = [], scalar_prefetch = 0 : i64, scratch_operands = 0 : i64, tpu.core_type = #tpu.core_type<tc>} {
    %0 = tpu.iota {dimensions = array<i32: 1>} : vector<1x256xi32>
    %c15_i32 = arith.constant 15 : i32
    %1 = vector.broadcast %c15_i32 : i32 to vector<1x256xi32>
    %2 = arith.andi %0, %1 : vector<1x256xi32>
    %c16_i32 = arith.constant 16 : i32
    %3 = vector.broadcast %c16_i32 : i32 to vector<1x256xi32>
    %4 = arith.cmpi sge, %0, %3 : vector<1x256xi32>
    %c240_i32 = arith.constant 240 : i32
    %5 = vector.broadcast %c240_i32 : i32 to vector<1x256xi32>
    %6 = arith.cmpi slt, %0, %5 : vector<1x256xi32>
    %c1_i32 = arith.constant 1 : i32
    %7 = vector.broadcast %c1_i32 : i32 to vector<1x256xi32>
    %8 = arith.cmpi sge, %2, %7 : vector<1x256xi32>
    %c15_i32_0 = arith.constant 15 : i32
    %9 = vector.broadcast %c15_i32_0 : i32 to vector<1x256xi32>
    %10 = arith.cmpi slt, %2, %9 : vector<1x256xi32>
    %c0 = arith.constant 0 : index
    %c0_1 = arith.constant 0 : index
    %c0_2 = arith.constant 0 : index
    %11 = vector.load %arg0[%c0, %c0_1, %c0_2] : memref<2x4x256xf32, #tpu.memory_space<vmem>>, vector<1x4x256xf32>
    %12 = vector.shape_cast %11 : vector<1x4x256xf32> to vector<4x256xf32>
    %c1 = arith.constant 1 : index
    %c0_3 = arith.constant 0 : index
    %c0_4 = arith.constant 0 : index
    %13 = vector.load %arg0[%c1, %c0_3, %c0_4] : memref<2x4x256xf32, #tpu.memory_space<vmem>>, vector<1x4x256xf32>
    %14 = vector.shape_cast %13 : vector<1x4x256xf32> to vector<4x256xf32>
    %c0_5 = arith.constant 0 : index
    %c0_6 = arith.constant 0 : index
    %15 = vector.load %arg1[%c0_5, %c0_6] : memref<8x36xbf16, #tpu.memory_space<vmem>>, vector<8x36xbf16>
    %16 = vector.shape_cast %4 : vector<1x256xi1> to vector<1x256xi1>
    %17 = vector.broadcast %16 : vector<1x256xi1> to vector<4x256xi1>
    %18 = vector.shape_cast %6 : vector<1x256xi1> to vector<1x256xi1>
    %19 = vector.broadcast %18 : vector<1x256xi1> to vector<4x256xi1>
    %20 = vector.shape_cast %8 : vector<1x256xi1> to vector<1x256xi1>
    %21 = vector.broadcast %20 : vector<1x256xi1> to vector<4x256xi1>
    %22 = vector.shape_cast %10 : vector<1x256xi1> to vector<1x256xi1>
    %23 = vector.broadcast %22 : vector<1x256xi1> to vector<4x256xi1>
    %c16_i32_7 = arith.constant 16 : i32
    %24 = tpu.dynamic_rotate %12 by %c16_i32_7 dim 1 : vector<4x256xf32>, i32 -> vector<4x256xf32>
    %cst = arith.constant 0.000000e+00 : f32
    %25 = vector.broadcast %cst : f32 to vector<4x256xf32>
    %26 = arith.select %17, %24, %25 : vector<4x256xi1>, vector<4x256xf32>
    %c1_i32_8 = arith.constant 1 : i32
    %27 = tpu.dynamic_rotate %26 by %c1_i32_8 dim 1 : vector<4x256xf32>, i32 -> vector<4x256xf32>
    %cst_9 = arith.constant 0.000000e+00 : f32
    %28 = vector.broadcast %cst_9 : f32 to vector<4x256xf32>
    %29 = arith.select %21, %27, %28 : vector<4x256xi1>, vector<4x256xf32>
    %c255_i32 = arith.constant 255 : i32
    %30 = tpu.dynamic_rotate %26 by %c255_i32 dim 1 : vector<4x256xf32>, i32 -> vector<4x256xf32>
    %cst_10 = arith.constant 0.000000e+00 : f32
    %31 = vector.broadcast %cst_10 : f32 to vector<4x256xf32>
    %32 = arith.select %23, %30, %31 : vector<4x256xi1>, vector<4x256xf32>
    %c1_i32_11 = arith.constant 1 : i32
    %33 = tpu.dynamic_rotate %12 by %c1_i32_11 dim 1 : vector<4x256xf32>, i32 -> vector<4x256xf32>
    %cst_12 = arith.constant 0.000000e+00 : f32
    %34 = vector.broadcast %cst_12 : f32 to vector<4x256xf32>
    %35 = arith.select %21, %33, %34 : vector<4x256xi1>, vector<4x256xf32>
    %c255_i32_13 = arith.constant 255 : i32
    %36 = tpu.dynamic_rotate %12 by %c255_i32_13 dim 1 : vector<4x256xf32>, i32 -> vector<4x256xf32>
    %cst_14 = arith.constant 0.000000e+00 : f32
    %37 = vector.broadcast %cst_14 : f32 to vector<4x256xf32>
    %38 = arith.select %23, %36, %37 : vector<4x256xi1>, vector<4x256xf32>
    %c240_i32_15 = arith.constant 240 : i32
    %39 = tpu.dynamic_rotate %12 by %c240_i32_15 dim 1 : vector<4x256xf32>, i32 -> vector<4x256xf32>
    %cst_16 = arith.constant 0.000000e+00 : f32
    %40 = vector.broadcast %cst_16 : f32 to vector<4x256xf32>
    %41 = arith.select %19, %39, %40 : vector<4x256xi1>, vector<4x256xf32>
    %c1_i32_17 = arith.constant 1 : i32
    %42 = tpu.dynamic_rotate %41 by %c1_i32_17 dim 1 : vector<4x256xf32>, i32 -> vector<4x256xf32>
    %cst_18 = arith.constant 0.000000e+00 : f32
    %43 = vector.broadcast %cst_18 : f32 to vector<4x256xf32>
    %44 = arith.select %21, %42, %43 : vector<4x256xi1>, vector<4x256xf32>
    %c255_i32_19 = arith.constant 255 : i32
    %45 = tpu.dynamic_rotate %41 by %c255_i32_19 dim 1 : vector<4x256xf32>, i32 -> vector<4x256xf32>
    %cst_20 = arith.constant 0.000000e+00 : f32
    %46 = vector.broadcast %cst_20 : f32 to vector<4x256xf32>
    %47 = arith.select %23, %45, %46 : vector<4x256xi1>, vector<4x256xf32>
    %48 = tpu.concatenate %29, %26, %32, %35, %12, %38, %44, %41, %47 in 0 : vector<4x256xf32>, vector<4x256xf32>, vector<4x256xf32>, vector<4x256xf32>, vector<4x256xf32>, vector<4x256xf32>, vector<4x256xf32>, vector<4x256xf32>, vector<4x256xf32> -> vector<36x256xf32>
    %49 = arith.truncf %48 : vector<36x256xf32> to vector<36x256xbf16>
    %cst_21 = arith.constant dense<0.000000e+00> : vector<8x256xf32>
    %50 = tpu.matmul %15, %49, %cst_21 {dimension_numbers = #tpu.dot_dimension_numbers<[1], [0], [0], [1], [0, 0, 1, 1], [], []>} : vector<8x36xbf16>, vector<36x256xbf16>, vector<8x256xf32> -> vector<8x256xf32>
    %c16_i32_22 = arith.constant 16 : i32
    %51 = tpu.dynamic_rotate %14 by %c16_i32_22 dim 1 : vector<4x256xf32>, i32 -> vector<4x256xf32>
    %cst_23 = arith.constant 0.000000e+00 : f32
    %52 = vector.broadcast %cst_23 : f32 to vector<4x256xf32>
    %53 = arith.select %17, %51, %52 : vector<4x256xi1>, vector<4x256xf32>
    %c1_i32_24 = arith.constant 1 : i32
    %54 = tpu.dynamic_rotate %53 by %c1_i32_24 dim 1 : vector<4x256xf32>, i32 -> vector<4x256xf32>
    %cst_25 = arith.constant 0.000000e+00 : f32
    %55 = vector.broadcast %cst_25 : f32 to vector<4x256xf32>
    %56 = arith.select %21, %54, %55 : vector<4x256xi1>, vector<4x256xf32>
    %c255_i32_26 = arith.constant 255 : i32
    %57 = tpu.dynamic_rotate %53 by %c255_i32_26 dim 1 : vector<4x256xf32>, i32 -> vector<4x256xf32>
    %cst_27 = arith.constant 0.000000e+00 : f32
    %58 = vector.broadcast %cst_27 : f32 to vector<4x256xf32>
    %59 = arith.select %23, %57, %58 : vector<4x256xi1>, vector<4x256xf32>
    %c1_i32_28 = arith.constant 1 : i32
    %60 = tpu.dynamic_rotate %14 by %c1_i32_28 dim 1 : vector<4x256xf32>, i32 -> vector<4x256xf32>
    %cst_29 = arith.constant 0.000000e+00 : f32
    %61 = vector.broadcast %cst_29 : f32 to vector<4x256xf32>
    %62 = arith.select %21, %60, %61 : vector<4x256xi1>, vector<4x256xf32>
    %c255_i32_30 = arith.constant 255 : i32
    %63 = tpu.dynamic_rotate %14 by %c255_i32_30 dim 1 : vector<4x256xf32>, i32 -> vector<4x256xf32>
    %cst_31 = arith.constant 0.000000e+00 : f32
    %64 = vector.broadcast %cst_31 : f32 to vector<4x256xf32>
    %65 = arith.select %23, %63, %64 : vector<4x256xi1>, vector<4x256xf32>
    %c240_i32_32 = arith.constant 240 : i32
    %66 = tpu.dynamic_rotate %14 by %c240_i32_32 dim 1 : vector<4x256xf32>, i32 -> vector<4x256xf32>
    %cst_33 = arith.constant 0.000000e+00 : f32
    %67 = vector.broadcast %cst_33 : f32 to vector<4x256xf32>
    %68 = arith.select %19, %66, %67 : vector<4x256xi1>, vector<4x256xf32>
    %c1_i32_34 = arith.constant 1 : i32
    %69 = tpu.dynamic_rotate %68 by %c1_i32_34 dim 1 : vector<4x256xf32>, i32 -> vector<4x256xf32>
    %cst_35 = arith.constant 0.000000e+00 : f32
    %70 = vector.broadcast %cst_35 : f32 to vector<4x256xf32>
    %71 = arith.select %21, %69, %70 : vector<4x256xi1>, vector<4x256xf32>
    %c255_i32_36 = arith.constant 255 : i32
    %72 = tpu.dynamic_rotate %68 by %c255_i32_36 dim 1 : vector<4x256xf32>, i32 -> vector<4x256xf32>
    %cst_37 = arith.constant 0.000000e+00 : f32
    %73 = vector.broadcast %cst_37 : f32 to vector<4x256xf32>
    %74 = arith.select %23, %72, %73 : vector<4x256xi1>, vector<4x256xf32>
    %75 = tpu.concatenate %56, %53, %59, %62, %14, %65, %71, %68, %74 in 0 : vector<4x256xf32>, vector<4x256xf32>, vector<4x256xf32>, vector<4x256xf32>, vector<4x256xf32>, vector<4x256xf32>, vector<4x256xf32>, vector<4x256xf32>, vector<4x256xf32> -> vector<36x256xf32>
    %76 = arith.truncf %75 : vector<36x256xf32> to vector<36x256xbf16>
    %cst_38 = arith.constant dense<0.000000e+00> : vector<8x256xf32>
    %77 = tpu.matmul %15, %76, %cst_38 {dimension_numbers = #tpu.dot_dimension_numbers<[1], [0], [0], [1], [0, 0, 1, 1], [], []>} : vector<8x36xbf16>, vector<36x256xbf16>, vector<8x256xf32> -> vector<8x256xf32>
    %c0_39 = arith.constant 0 : index
    %c0_40 = arith.constant 0 : index
    %78 = vector.load %arg2[%c0_39, %c0_40] : memref<8x1xf32, #tpu.memory_space<vmem>>, vector<8x1xf32>
    %c0_41 = arith.constant 0 : index
    %c0_42 = arith.constant 0 : index
    %79 = vector.load %arg3[%c0_41, %c0_42] : memref<8x1xf32, #tpu.memory_space<vmem>>, vector<8x1xf32>
    %cst_43 = arith.constant dense<0.000000e+00> : vector<8xf32>
    %80 = vector.multi_reduction <add>, %50, %cst_43 [1] : vector<8x256xf32> to vector<8xf32>
    %81 = vector.shape_cast %80 : vector<8xf32> to vector<8x1xf32>
    %cst_44 = arith.constant 0.000000e+00 : f32
    %82 = vector.broadcast %cst_44 : f32 to vector<8x1xf32>
    %83 = arith.addf %82, %81 : vector<8x1xf32>
    %cst_45 = arith.constant dense<0.000000e+00> : vector<8xf32>
    %84 = vector.multi_reduction <add>, %77, %cst_45 [1] : vector<8x256xf32> to vector<8xf32>
    %85 = vector.shape_cast %84 : vector<8xf32> to vector<8x1xf32>
    %86 = arith.addf %83, %85 : vector<8x1xf32>
    %cst_46 = arith.constant 5.120000e+02 : f32
    %87 = vector.broadcast %cst_46 : f32 to vector<8x1xf32>
    %88 = arith.divf %86, %87 : vector<8x1xf32>
    %89 = vector.broadcast %88 : vector<8x1xf32> to vector<8x256xf32>
    %90 = arith.subf %50, %89 : vector<8x256xf32>
    %91 = arith.mulf %90, %90 : vector<8x256xf32>
    %cst_47 = arith.constant dense<0.000000e+00> : vector<8xf32>
    %92 = vector.multi_reduction <add>, %91, %cst_47 [1] : vector<8x256xf32> to vector<8xf32>
    %93 = vector.shape_cast %92 : vector<8xf32> to vector<8x1xf32>
    %cst_48 = arith.constant 0.000000e+00 : f32
    %94 = vector.broadcast %cst_48 : f32 to vector<8x1xf32>
    %95 = arith.addf %94, %93 : vector<8x1xf32>
    %96 = vector.broadcast %88 : vector<8x1xf32> to vector<8x256xf32>
    %97 = arith.subf %77, %96 : vector<8x256xf32>
    %98 = arith.mulf %97, %97 : vector<8x256xf32>
    %cst_49 = arith.constant dense<0.000000e+00> : vector<8xf32>
    %99 = vector.multi_reduction <add>, %98, %cst_49 [1] : vector<8x256xf32> to vector<8xf32>
    %100 = vector.shape_cast %99 : vector<8xf32> to vector<8x1xf32>
    %101 = arith.addf %95, %100 : vector<8x1xf32>
    %cst_50 = arith.constant 5.120000e+02 : f32
    %102 = vector.broadcast %cst_50 : f32 to vector<8x1xf32>
    %103 = arith.divf %101, %102 : vector<8x1xf32>
    %cst_51 = arith.constant 9.99999974E-6 : f32
    %104 = vector.broadcast %cst_51 : f32 to vector<8x1xf32>
    %105 = arith.addf %103, %104 : vector<8x1xf32>
    %106 = math.rsqrt %105 : vector<8x1xf32>
    %107 = arith.mulf %78, %106 : vector<8x1xf32>
    %108 = arith.mulf %88, %107 : vector<8x1xf32>
    %109 = arith.subf %79, %108 : vector<8x1xf32>
    %110 = vector.broadcast %107 : vector<8x1xf32> to vector<8x256xf32>
    %111 = arith.mulf %50, %110 : vector<8x256xf32>
    %112 = vector.broadcast %109 : vector<8x1xf32> to vector<8x256xf32>
    %113 = arith.addf %111, %112 : vector<8x256xf32>
    %cst_52 = arith.constant 0.000000e+00 : f32
    %114 = vector.broadcast %cst_52 : f32 to vector<8x256xf32>
    %115 = arith.maximumf %113, %114 : vector<8x256xf32>
    %116 = vector.broadcast %107 : vector<8x1xf32> to vector<8x256xf32>
    %117 = arith.mulf %77, %116 : vector<8x256xf32>
    %118 = vector.broadcast %109 : vector<8x1xf32> to vector<8x256xf32>
    %119 = arith.addf %117, %118 : vector<8x256xf32>
    %cst_53 = arith.constant 0.000000e+00 : f32
    %120 = vector.broadcast %cst_53 : f32 to vector<8x256xf32>
    %121 = arith.maximumf %119, %120 : vector<8x256xf32>
    %c0_54 = arith.constant 0 : index
    %c0_55 = arith.constant 0 : index
    %122 = vector.load %arg4[%c0_54, %c0_55] : memref<8x72xbf16, #tpu.memory_space<vmem>>, vector<8x72xbf16>
    %123 = vector.shape_cast %4 : vector<1x256xi1> to vector<1x256xi1>
    %124 = vector.broadcast %123 : vector<1x256xi1> to vector<8x256xi1>
    %125 = vector.shape_cast %6 : vector<1x256xi1> to vector<1x256xi1>
    %126 = vector.broadcast %125 : vector<1x256xi1> to vector<8x256xi1>
    %127 = vector.shape_cast %8 : vector<1x256xi1> to vector<1x256xi1>
    %128 = vector.broadcast %127 : vector<1x256xi1> to vector<8x256xi1>
    %129 = vector.shape_cast %10 : vector<1x256xi1> to vector<1x256xi1>
    %130 = vector.broadcast %129 : vector<1x256xi1> to vector<8x256xi1>
    %c16_i32_56 = arith.constant 16 : i32
    %131 = tpu.dynamic_rotate %115 by %c16_i32_56 dim 1 : vector<8x256xf32>, i32 -> vector<8x256xf32>
    %cst_57 = arith.constant 0.000000e+00 : f32
    %132 = vector.broadcast %cst_57 : f32 to vector<8x256xf32>
    %133 = arith.select %124, %131, %132 : vector<8x256xi1>, vector<8x256xf32>
    %c1_i32_58 = arith.constant 1 : i32
    %134 = tpu.dynamic_rotate %133 by %c1_i32_58 dim 1 : vector<8x256xf32>, i32 -> vector<8x256xf32>
    %cst_59 = arith.constant 0.000000e+00 : f32
    %135 = vector.broadcast %cst_59 : f32 to vector<8x256xf32>
    %136 = arith.select %128, %134, %135 : vector<8x256xi1>, vector<8x256xf32>
    %c255_i32_60 = arith.constant 255 : i32
    %137 = tpu.dynamic_rotate %133 by %c255_i32_60 dim 1 : vector<8x256xf32>, i32 -> vector<8x256xf32>
    %cst_61 = arith.constant 0.000000e+00 : f32
    %138 = vector.broadcast %cst_61 : f32 to vector<8x256xf32>
    %139 = arith.select %130, %137, %138 : vector<8x256xi1>, vector<8x256xf32>
    %c1_i32_62 = arith.constant 1 : i32
    %140 = tpu.dynamic_rotate %115 by %c1_i32_62 dim 1 : vector<8x256xf32>, i32 -> vector<8x256xf32>
    %cst_63 = arith.constant 0.000000e+00 : f32
    %141 = vector.broadcast %cst_63 : f32 to vector<8x256xf32>
    %142 = arith.select %128, %140, %141 : vector<8x256xi1>, vector<8x256xf32>
    %c255_i32_64 = arith.constant 255 : i32
    %143 = tpu.dynamic_rotate %115 by %c255_i32_64 dim 1 : vector<8x256xf32>, i32 -> vector<8x256xf32>
    %cst_65 = arith.constant 0.000000e+00 : f32
    %144 = vector.broadcast %cst_65 : f32 to vector<8x256xf32>
    %145 = arith.select %130, %143, %144 : vector<8x256xi1>, vector<8x256xf32>
    %c240_i32_66 = arith.constant 240 : i32
    %146 = tpu.dynamic_rotate %115 by %c240_i32_66 dim 1 : vector<8x256xf32>, i32 -> vector<8x256xf32>
    %cst_67 = arith.constant 0.000000e+00 : f32
    %147 = vector.broadcast %cst_67 : f32 to vector<8x256xf32>
    %148 = arith.select %126, %146, %147 : vector<8x256xi1>, vector<8x256xf32>
    %c1_i32_68 = arith.constant 1 : i32
    %149 = tpu.dynamic_rotate %148 by %c1_i32_68 dim 1 : vector<8x256xf32>, i32 -> vector<8x256xf32>
    %cst_69 = arith.constant 0.000000e+00 : f32
    %150 = vector.broadcast %cst_69 : f32 to vector<8x256xf32>
    %151 = arith.select %128, %149, %150 : vector<8x256xi1>, vector<8x256xf32>
    %c255_i32_70 = arith.constant 255 : i32
    %152 = tpu.dynamic_rotate %148 by %c255_i32_70 dim 1 : vector<8x256xf32>, i32 -> vector<8x256xf32>
    %cst_71 = arith.constant 0.000000e+00 : f32
    %153 = vector.broadcast %cst_71 : f32 to vector<8x256xf32>
    %154 = arith.select %130, %152, %153 : vector<8x256xi1>, vector<8x256xf32>
    %155 = tpu.concatenate %136, %133, %139, %142, %115, %145, %151, %148, %154 in 0 : vector<8x256xf32>, vector<8x256xf32>, vector<8x256xf32>, vector<8x256xf32>, vector<8x256xf32>, vector<8x256xf32>, vector<8x256xf32>, vector<8x256xf32>, vector<8x256xf32> -> vector<72x256xf32>
    %156 = arith.truncf %155 : vector<72x256xf32> to vector<72x256xbf16>
    %cst_72 = arith.constant dense<0.000000e+00> : vector<8x256xf32>
    %157 = tpu.matmul %122, %156, %cst_72 {dimension_numbers = #tpu.dot_dimension_numbers<[1], [0], [0], [1], [0, 0, 1, 1], [], []>} : vector<8x72xbf16>, vector<72x256xbf16>, vector<8x256xf32> -> vector<8x256xf32>
    %c16_i32_73 = arith.constant 16 : i32
    %158 = tpu.dynamic_rotate %121 by %c16_i32_73 dim 1 : vector<8x256xf32>, i32 -> vector<8x256xf32>
    %cst_74 = arith.constant 0.000000e+00 : f32
    %159 = vector.broadcast %cst_74 : f32 to vector<8x256xf32>
    %160 = arith.select %124, %158, %159 : vector<8x256xi1>, vector<8x256xf32>
    %c1_i32_75 = arith.constant 1 : i32
    %161 = tpu.dynamic_rotate %160 by %c1_i32_75 dim 1 : vector<8x256xf32>, i32 -> vector<8x256xf32>
    %cst_76 = arith.constant 0.000000e+00 : f32
    %162 = vector.broadcast %cst_76 : f32 to vector<8x256xf32>
    %163 = arith.select %128, %161, %162 : vector<8x256xi1>, vector<8x256xf32>
    %c255_i32_77 = arith.constant 255 : i32
    %164 = tpu.dynamic_rotate %160 by %c255_i32_77 dim 1 : vector<8x256xf32>, i32 -> vector<8x256xf32>
    %cst_78 = arith.constant 0.000000e+00 : f32
    %165 = vector.broadcast %cst_78 : f32 to vector<8x256xf32>
    %166 = arith.select %130, %164, %165 : vector<8x256xi1>, vector<8x256xf32>
    %c1_i32_79 = arith.constant 1 : i32
    %167 = tpu.dynamic_rotate %121 by %c1_i32_79 dim 1 : vector<8x256xf32>, i32 -> vector<8x256xf32>
    %cst_80 = arith.constant 0.000000e+00 : f32
    %168 = vector.broadcast %cst_80 : f32 to vector<8x256xf32>
    %169 = arith.select %128, %167, %168 : vector<8x256xi1>, vector<8x256xf32>
    %c255_i32_81 = arith.constant 255 : i32
    %170 = tpu.dynamic_rotate %121 by %c255_i32_81 dim 1 : vector<8x256xf32>, i32 -> vector<8x256xf32>
    %cst_82 = arith.constant 0.000000e+00 : f32
    %171 = vector.broadcast %cst_82 : f32 to vector<8x256xf32>
    %172 = arith.select %130, %170, %171 : vector<8x256xi1>, vector<8x256xf32>
    %c240_i32_83 = arith.constant 240 : i32
    %173 = tpu.dynamic_rotate %121 by %c240_i32_83 dim 1 : vector<8x256xf32>, i32 -> vector<8x256xf32>
    %cst_84 = arith.constant 0.000000e+00 : f32
    %174 = vector.broadcast %cst_84 : f32 to vector<8x256xf32>
    %175 = arith.select %126, %173, %174 : vector<8x256xi1>, vector<8x256xf32>
    %c1_i32_85 = arith.constant 1 : i32
    %176 = tpu.dynamic_rotate %175 by %c1_i32_85 dim 1 : vector<8x256xf32>, i32 -> vector<8x256xf32>
    %cst_86 = arith.constant 0.000000e+00 : f32
    %177 = vector.broadcast %cst_86 : f32 to vector<8x256xf32>
    %178 = arith.select %128, %176, %177 : vector<8x256xi1>, vector<8x256xf32>
    %c255_i32_87 = arith.constant 255 : i32
    %179 = tpu.dynamic_rotate %175 by %c255_i32_87 dim 1 : vector<8x256xf32>, i32 -> vector<8x256xf32>
    %cst_88 = arith.constant 0.000000e+00 : f32
    %180 = vector.broadcast %cst_88 : f32 to vector<8x256xf32>
    %181 = arith.select %130, %179, %180 : vector<8x256xi1>, vector<8x256xf32>
    %182 = tpu.concatenate %163, %160, %166, %169, %121, %172, %178, %175, %181 in 0 : vector<8x256xf32>, vector<8x256xf32>, vector<8x256xf32>, vector<8x256xf32>, vector<8x256xf32>, vector<8x256xf32>, vector<8x256xf32>, vector<8x256xf32>, vector<8x256xf32> -> vector<72x256xf32>
    %183 = arith.truncf %182 : vector<72x256xf32> to vector<72x256xbf16>
    %cst_89 = arith.constant dense<0.000000e+00> : vector<8x256xf32>
    %184 = tpu.matmul %122, %183, %cst_89 {dimension_numbers = #tpu.dot_dimension_numbers<[1], [0], [0], [1], [0, 0, 1, 1], [], []>} : vector<8x72xbf16>, vector<72x256xbf16>, vector<8x256xf32> -> vector<8x256xf32>
    %c0_90 = arith.constant 0 : index
    %c0_91 = arith.constant 0 : index
    %185 = vector.load %arg5[%c0_90, %c0_91] : memref<8x1xf32, #tpu.memory_space<vmem>>, vector<8x1xf32>
    %c0_92 = arith.constant 0 : index
    %c0_93 = arith.constant 0 : index
    %186 = vector.load %arg6[%c0_92, %c0_93] : memref<8x1xf32, #tpu.memory_space<vmem>>, vector<8x1xf32>
    %cst_94 = arith.constant dense<0.000000e+00> : vector<8xf32>
    %187 = vector.multi_reduction <add>, %157, %cst_94 [1] : vector<8x256xf32> to vector<8xf32>
    %188 = vector.shape_cast %187 : vector<8xf32> to vector<8x1xf32>
    %cst_95 = arith.constant 0.000000e+00 : f32
    %189 = vector.broadcast %cst_95 : f32 to vector<8x1xf32>
    %190 = arith.addf %189, %188 : vector<8x1xf32>
    %cst_96 = arith.constant dense<0.000000e+00> : vector<8xf32>
    %191 = vector.multi_reduction <add>, %184, %cst_96 [1] : vector<8x256xf32> to vector<8xf32>
    %192 = vector.shape_cast %191 : vector<8xf32> to vector<8x1xf32>
    %193 = arith.addf %190, %192 : vector<8x1xf32>
    %cst_97 = arith.constant 5.120000e+02 : f32
    %194 = vector.broadcast %cst_97 : f32 to vector<8x1xf32>
    %195 = arith.divf %193, %194 : vector<8x1xf32>
    %196 = vector.broadcast %195 : vector<8x1xf32> to vector<8x256xf32>
    %197 = arith.subf %157, %196 : vector<8x256xf32>
    %198 = arith.mulf %197, %197 : vector<8x256xf32>
    %cst_98 = arith.constant dense<0.000000e+00> : vector<8xf32>
    %199 = vector.multi_reduction <add>, %198, %cst_98 [1] : vector<8x256xf32> to vector<8xf32>
    %200 = vector.shape_cast %199 : vector<8xf32> to vector<8x1xf32>
    %cst_99 = arith.constant 0.000000e+00 : f32
    %201 = vector.broadcast %cst_99 : f32 to vector<8x1xf32>
    %202 = arith.addf %201, %200 : vector<8x1xf32>
    %203 = vector.broadcast %195 : vector<8x1xf32> to vector<8x256xf32>
    %204 = arith.subf %184, %203 : vector<8x256xf32>
    %205 = arith.mulf %204, %204 : vector<8x256xf32>
    %cst_100 = arith.constant dense<0.000000e+00> : vector<8xf32>
    %206 = vector.multi_reduction <add>, %205, %cst_100 [1] : vector<8x256xf32> to vector<8xf32>
    %207 = vector.shape_cast %206 : vector<8xf32> to vector<8x1xf32>
    %208 = arith.addf %202, %207 : vector<8x1xf32>
    %cst_101 = arith.constant 5.120000e+02 : f32
    %209 = vector.broadcast %cst_101 : f32 to vector<8x1xf32>
    %210 = arith.divf %208, %209 : vector<8x1xf32>
    %cst_102 = arith.constant 9.99999974E-6 : f32
    %211 = vector.broadcast %cst_102 : f32 to vector<8x1xf32>
    %212 = arith.addf %210, %211 : vector<8x1xf32>
    %213 = math.rsqrt %212 : vector<8x1xf32>
    %214 = arith.mulf %185, %213 : vector<8x1xf32>
    %215 = arith.mulf %195, %214 : vector<8x1xf32>
    %216 = arith.subf %186, %215 : vector<8x1xf32>
    %217 = vector.broadcast %214 : vector<8x1xf32> to vector<8x256xf32>
    %218 = arith.mulf %157, %217 : vector<8x256xf32>
    %219 = vector.broadcast %216 : vector<8x1xf32> to vector<8x256xf32>
    %220 = arith.addf %218, %219 : vector<8x256xf32>
    %cst_103 = arith.constant 0.000000e+00 : f32
    %221 = vector.broadcast %cst_103 : f32 to vector<8x256xf32>
    %222 = arith.maximumf %220, %221 : vector<8x256xf32>
    %223 = vector.broadcast %214 : vector<8x1xf32> to vector<8x256xf32>
    %224 = arith.mulf %184, %223 : vector<8x256xf32>
    %225 = vector.broadcast %216 : vector<8x1xf32> to vector<8x256xf32>
    %226 = arith.addf %224, %225 : vector<8x256xf32>
    %cst_104 = arith.constant 0.000000e+00 : f32
    %227 = vector.broadcast %cst_104 : f32 to vector<8x256xf32>
    %228 = arith.maximumf %226, %227 : vector<8x256xf32>
    %c0_105 = arith.constant 0 : index
    %c0_106 = arith.constant 0 : index
    %c0_107 = arith.constant 0 : index
    %229 = vector.load %arg7[%c0_105, %c0_106, %c0_107] : memref<2x8x256xf32, #tpu.memory_space<vmem>>, vector<1x8x256xf32>
    %230 = vector.shape_cast %229 : vector<1x8x256xf32> to vector<8x256xf32>
    %231 = vector.shape_cast %222 : vector<8x256xf32> to vector<1x8x256xf32>
    tpu.vector_store %arg7[%c0_105, %c0_106, %c0_107], %231 {strides = array<i32>} : memref<2x8x256xf32, #tpu.memory_space<vmem>>, vector<1x8x256xf32>,
    %c1_108 = arith.constant 1 : index
    %c0_109 = arith.constant 0 : index
    %c0_110 = arith.constant 0 : index
    %232 = vector.load %arg7[%c1_108, %c0_109, %c0_110] : memref<2x8x256xf32, #tpu.memory_space<vmem>>, vector<1x8x256xf32>
    %233 = vector.shape_cast %232 : vector<1x8x256xf32> to vector<8x256xf32>
    %234 = vector.shape_cast %228 : vector<8x256xf32> to vector<1x8x256xf32>
    tpu.vector_store %arg7[%c1_108, %c0_109, %c0_110], %234 {strides = array<i32>} : memref<2x8x256xf32, #tpu.memory_space<vmem>>, vector<1x8x256xf32>,
    return
  }
}

</mosaic_0001>

<bundles_post_ra>
// kernel: tpu_custom_call.1
= control target key start
LH: loop header
LB: loop body
LE: loop exit
PB: predicated region body
PF: predicated region fallthrough
CT: control target
= control target key end

     0   :  { %s1599_s0 = inlined_call_operand.vmem [shape: f32[2,4,256], index: 0, kind: input, shape index: {}]   ;;  %s1600_s1 = inlined_call_operand.vmem [shape: bf16[8,36], index: 1, kind: input, shape index: {}]   ;;  %s1601_s2 = inlined_call_operand.vmem [shape: f32[8,1], index: 2, kind: input, shape index: {}]   ;;  %s1602_s3 = inlined_call_operand.vmem [shape: f32[8,1], index: 3, kind: input, shape index: {}]   ;;  %s1603_s4 = inlined_call_operand.vmem [shape: bf16[8,72], index: 4, kind: input, shape index: {}]   ;;  %s1604_s5 = inlined_call_operand.vmem [shape: f32[8,1], index: 5, kind: input, shape index: {}]   ;;  %s1605_s6 = inlined_call_operand.vmem [shape: f32[8,1], index: 6, kind: input, shape index: {}]   ;;  %s1606_s7 = inlined_call_operand.hbm [shape: f32[2,8,256], index: 7, kind: output, shape index: {}]  }
   0x1   :  { %v1062_v0 = vld [vmem:[%s1599_s0] sm:$0xff]  ;;  %v1067_v1 = vld [vmem:[%s1599_s0 + $0x8] sm:$0xff] }
   0x2   :  { %12 = vsyncpa [#allocation3], 0  ;;  %v1071_v2 = vcombine.high %v1062_v0, %v1062_v0  ;;  %v1075_v3 = vcombine.high %v1067_v1, %v1067_v1  ;;  %s1011_s28 = smov 16   ;;  %s1012_s29 = smov 112   ;;  %v28_v6 = vlaneseq  ;;  %v1015_v37 = vmov 0  }
   0x3   :  { %s1013_s0 = smov 1   ;;  %s1014_s30 = smov 127   ;;  %214 = vmatprep.mubr.bf16.mxu0 %v1015_v37  ;;  %366 = vmatprep.mubr.bf16.mxu1 %v1015_v37  ;;  %vm156_vm9 = vcmask 1043456   ;;  %vm175_vm11 = vcmask 1041408   ;;  %vm171_vm12 = vcmask 293888   ;;  %vm1016_vm13 = vmmov 1  }
   0x4   :  { %v819_v4 = vpack.i.bf16 %v1071_v2, %v1062_v0  ;;  %v824_v5 = vpack.i.bf16 %v1075_v3, %v1067_v1  ;;  %v1089_v7 = vand.u32 127, %v28_v6  ;;  %899 = vset.pattern.permute.xlu1 %v1015_v37  ;;  %900 = vset.pattern.permute.xlu0 %v1015_v37  ;;  %v431_v52 = vld [vmem:[%s1603_s4] sm:$0xf]  ;;  %s1017_s16 = smov [#allocation2]  }
   0x5   :  { %s743_s17 = sshll.u32 %s1017_s16, 4  ;;  %s744_s17 = int_to_ptr.vmem [resolvable:$true] %s743_s17 }
   0x6   :  { %820 = vrot.lane.b32.xlu0 %v819_v4, %s1011_s28  ;;  %830 = vrot.lane.b32.xlu1 %v819_v4, %s1012_s29  ;;  %vm68_vm0 = vcmp.lt.s32.totalorder %v1089_v7, 16  ;;  %vm33_vm1 = vcmp.ge.s32.totalorder %v1089_v7, 16  ;;  %vm111_vm2 = vcmp.lt.s32.totalorder %v1089_v7, 112  ;;  %v1105_v19 = vadd.s32 128, %v1089_v7  ;;  %p992_p1 = scmp.lt.s32.totalorder %s744_s17, %s744_s17 }
   0x7   :  { %vm86_vm4 = vcmp.lt.s32.totalorder %v1089_v7, 127  ;;  %v31_v47 = vand.u32 15, %v1089_v7  ;;  %vm77_vm5 = vcmp.lt.s32.totalorder %v1089_v7, 1 }
   0x8   :  { %vm36_vm3 = vcmp.lt.s32.totalorder %v1105_v19, 240  ;;  %v32_v46 = vand.u32 15, %v1105_v19 }
   0x9   :  { %vm1166_vm7 = vcmp.lt.s32.totalorder %v31_v47, 15  ;;  %vm1182_vm10 = vcmp.ge.s32.totalorder %v31_v47, 1 }
   0xa   :  { %825 = vrot.lane.b32.xlu0 %v824_v5, %s1011_s28  ;;  %835 = vrot.lane.b32.xlu1 %v824_v5, %s1012_s29  ;;  %vm1162_vm6 = vcmp.lt.s32.totalorder %v32_v46, 15  ;;  %vm1178_vm8 = vcmp.ge.s32.totalorder %v32_v46, 1  ;;  %vm1430_vm15 = vmpackc.low %vm33_vm1, %vm1182_vm10 }
   0xb   :  { %vm1422_vm14 = vmpackc.low %vm1016_vm13, %vm1178_vm8 }
   0xe   :  { %845 = vrot.lane.b32.xlu1 %v824_v5, %s1013_s0  ;;  %840 = vrot.lane.b32.xlu0 %v819_v4, %s1013_s0 }
  0x12   :  { %855 = vrot.lane.b32.xlu1 %v824_v5, %s1014_s30  ;;  %850 = vrot.lane.b32.xlu0 %v819_v4, %s1014_s30 }
  0x78   :  { %v821_v8 = vpop.permute.xlu0 %820  ;;  %v831_v9 = vpop.permute.xlu1 %830 }
  0x79   :  { %v823_v10 = vunpack.i.h.bf16 %v821_v8  ;;  %v822_v11 = vunpack.i.l.bf16 %v821_v8  ;;  %v833_v14 = vunpack.i.h.bf16 %v831_v9  ;;  %v832_v15 = vunpack.i.l.bf16 %v831_v9 }
  0x7b   :  { %v70_v12 = vsel %vm68_vm0, %v823_v10, %v822_v11  ;;  %v1098_v13 = vsel %vm68_vm0, %v822_v11, %v823_v10  ;;  %v113_v28 = vsel %vm111_vm2, %v833_v14, %v832_v15  ;;  %v1138_v33 = vsel %vm111_vm2, %v832_v15, %v833_v14 }
  0x7c   :  { %v826_v16 = vpop.permute.xlu0 %825  ;;  %v836_v17 = vpop.permute.xlu1 %835  ;;  %v1102_v18 = vsel %vm33_vm1, %v70_v12, 0.0  ;;  %v1142_v34 = vsel %vm36_vm3, %v113_v28, 0.0  ;;  %v152_v10 = vrot.slane %v1138_v33, 4  ;;  %v135_v12 = vrot.slane %v1098_v13, 4 }
  0x7d   :  { %v828_v20 = vunpack.i.h.bf16 %v826_v16  ;;  %v827_v21 = vunpack.i.l.bf16 %v826_v16  ;;  %v838_v22 = vunpack.i.h.bf16 %v836_v17  ;;  %v837_v23 = vunpack.i.l.bf16 %v836_v17 }
  0x7e   :  { %v864_v24 = vpack.i.bf16 %v1098_v13, %v1102_v18  ;;  %v879_v36 = vpack.i.bf16 %v1142_v34, %v1138_v33  ;;  %v153_v11 = vrot.slane %v1142_v34, 4  ;;  %v134_v13 = vrot.slane %v1102_v18, 4 }
  0x7f   :  { %v231_v25 = vsel %vm68_vm0, %v828_v20, %v827_v21  ;;  %v271_v26 = vsel %vm111_vm2, %v838_v22, %v837_v23  ;;  %v1115_v27 = vsel %vm68_vm0, %v827_v21, %v828_v20  ;;  %v1130_v31 = vsel %vm111_vm2, %v837_v23, %v838_v22 }
  0x80   :  { %865 = vrot.lane.b32.xlu1 %v864_v24, %s1014_s30  ;;  %860 = vrot.lane.b32.xlu0 %v864_v24, %s1013_s0  ;;  %v1123_v29 = vsel %vm33_vm1, %v231_v25, 0.0  ;;  %v1134_v32 = vsel %vm36_vm3, %v271_v26, 0.0  ;;  %v846_v38 = vpop.permute.xlu1 %845  ;;  %v841_v39 = vpop.permute.xlu0 %840  ;;  %v310_v9 = vrot.slane %v1130_v31, 4  ;;  %v293_v25 = vrot.slane %v1115_v27, 4 }
  0x81   :  { %v874_v30 = vpack.i.bf16 %v1115_v27, %v1123_v29  ;;  %v884_v35 = vpack.i.bf16 %v1134_v32, %v1130_v31  ;;  %v848_v48 = vunpack.i.h.bf16 %v846_v38  ;;  %v847_v49 = vunpack.i.l.bf16 %v846_v38 }
  0x82   :  { %v843_v50 = vunpack.i.h.bf16 %v841_v39  ;;  %v842_v51 = vunpack.i.l.bf16 %v841_v39  ;;  %v311_v24 = vrot.slane %v1134_v32, 4  ;;  %v292_v26 = vrot.slane %v1123_v29, 4 }
  0x83   :  { %v254_v60 = vsel %vm77_vm5, %v847_v49, %v848_v48  ;;  %v255_v61 = vsel %vm77_vm5, %v848_v48, %v847_v49 }
  0x84   :  { %875 = vrot.lane.b32.xlu1 %v874_v30, %s1014_s30  ;;  %870 = vrot.lane.b32.xlu0 %v874_v30, %s1013_s0  ;;  %v856_v40 = vpop.permute.xlu1 %855  ;;  %v851_v41 = vpop.permute.xlu0 %850  ;;  %v95_v62 = vsel %vm77_vm5, %v842_v51, %v843_v50  ;;  %v96_v63 = vsel %vm77_vm5, %v843_v50, %v842_v51  ;;  %v257_v16 = vsel %vm1178_vm8, %v254_v60, 0.0  ;;  %v256_v17 = vsel %vm1182_vm10, %v255_v61, 0.0 }
  0x85   :  { %v858_v42 = vunpack.i.h.bf16 %v856_v40  ;;  %v857_v43 = vunpack.i.l.bf16 %v856_v40  ;;  %v853_v44 = vunpack.i.h.bf16 %v851_v41  ;;  %v852_v45 = vunpack.i.l.bf16 %v851_v41 }
  0x86   :  { %v98_v14 = vsel %vm1178_vm8, %v95_v62, 0.0  ;;  %v97_v15 = vsel %vm1182_vm10, %v96_v63, 0.0  ;;  %v299_v38 = vrot.slane %v257_v16, 4  ;;  %v298_v39 = vrot.slane %v256_v17, 4 }
  0x87   :  { %v262_v54 = vsel %vm86_vm4, %v857_v43, %v858_v42  ;;  %v263_v55 = vsel %vm86_vm4, %v858_v42, %v857_v43  ;;  %v103_v56 = vsel %vm86_vm4, %v852_v45, %v853_v44  ;;  %v104_v57 = vsel %vm86_vm4, %v853_v44, %v852_v45 }
  0x88   :  { %885 = vrot.lane.b32.xlu1 %v884_v35, %s1013_s0  ;;  %880 = vrot.lane.b32.xlu0 %v879_v36, %s1013_s0  ;;  %v264_v4 = vsel %vm1166_vm7, %v262_v54, 0.0  ;;  %v265_v5 = vsel %vm1162_vm6, %v263_v55, 0.0  ;;  %v105_v6 = vsel %vm1166_vm7, %v103_v56, 0.0  ;;  %v106_v8 = vsel %vm1162_vm6, %v104_v57, 0.0 }
  0x89   :  { %v304_v20 = vrot.slane %v264_v4, 4  ;;  %v305_v21 = vrot.slane %v265_v5, 4  ;;  %v146_v22 = vrot.slane %v105_v6, 4  ;;  %v147_v23 = vrot.slane %v106_v8, 4 }
  0x8b   :  { %v1220_v44 = vsel %vm156_vm9, %v1071_v2, %v147_v23  ;;  %v1224_v18 = vsel %vm156_vm9, %v1075_v3, %v305_v21  ;;  %v1228_v27 = vsel %vm156_vm9, %v1062_v0, %v146_v22  ;;  %v1232_v29 = vsel %vm156_vm9, %v1067_v1, %v304_v20 }
  0x8c   :  { %895 = vrot.lane.b32.xlu1 %v884_v35, %s1014_s30  ;;  %890 = vrot.lane.b32.xlu0 %v879_v36, %s1014_s30  ;;  %v141_v35 = vrot.slane %v98_v14, 4  ;;  %v140_v36 = vrot.slane %v97_v15, 4 }
  0xf2   :  { %v866_v28 = vpop.permute.xlu1 %865  ;;  %v861_v30 = vpop.permute.xlu0 %860 }
  0xf3   :  { %v868_v40 = vunpack.i.h.bf16 %v866_v28  ;;  %v867_v41 = vunpack.i.l.bf16 %v866_v28  ;;  %v863_v42 = vunpack.i.h.bf16 %v861_v30  ;;  %v862_v43 = vunpack.i.l.bf16 %v861_v30 }
  0xf5   :  { %v78_v45 = vsel %vm77_vm5, %v862_v43, %v863_v42  ;;  %v88_v46 = vsel %vm86_vm4, %v868_v40, %v867_v41  ;;  %v79_v2 = vsel %vm77_vm5, %v863_v42, %v862_v43  ;;  %v87_v3 = vsel %vm86_vm4, %v867_v41, %v868_v40 }
  0xf6   :  { %v876_v47 = vpop.permute.xlu1 %875  ;;  %v871_v48 = vpop.permute.xlu0 %870  ;;  %v81_v0 = vsel %vm1178_vm8, %v78_v45, 0.0  ;;  %v90_v1 = vsel %vm1162_vm6, %v88_v46, 0.0  ;;  %v80_v49 = vsel %vm1182_vm10, %v79_v2, 0.0  ;;  %v89_v50 = vsel %vm1166_vm7, %v87_v3, 0.0 }
  0xf7   :  { %v878_v51 = vunpack.i.h.bf16 %v876_v47  ;;  %v877_v54 = vunpack.i.l.bf16 %v876_v47  ;;  %v873_v55 = vunpack.i.h.bf16 %v871_v48  ;;  %v872_v56 = vunpack.i.l.bf16 %v871_v48 }
  0xf8   :  { %v158_v57 = vsel %vm156_vm9, %v81_v0, %v135_v12  ;;  %v160_v60 = vsel %vm156_vm9, %v90_v1, %v141_v35  ;;  %v157_v61 = vsel %vm156_vm9, %v80_v49, %v134_v13  ;;  %v159_v62 = vsel %vm156_vm9, %v89_v50, %v140_v36 }
  0xf9   :  { %v166_v63 = vpack.c.bf16 %v160_v60, %v158_v57  ;;  %v165_v4 = vpack.c.bf16 %v159_v62, %v157_v61  ;;  %v238_v5 = vsel %vm77_vm5, %v872_v56, %v873_v55  ;;  %v247_v6 = vsel %vm86_vm4, %v878_v51, %v877_v54 }
  0xfa   :  { %v886_v8 = vpop.permute.xlu1 %885  ;;  %v881_v14 = vpop.permute.xlu0 %880  ;;  %v241_v15 = vsel %vm1178_vm8, %v238_v5, 0.0  ;;  %v249_v12 = vsel %vm1162_vm6, %v247_v6, 0.0  ;;  %v239_v16 = vsel %vm77_vm5, %v873_v55, %v872_v56  ;;  %v246_v17 = vsel %vm86_vm4, %v877_v54, %v878_v51 }
  0xfb   :  { %v888_v20 = vunpack.i.h.bf16 %v886_v8  ;;  %v887_v21 = vunpack.i.l.bf16 %v886_v8  ;;  %v883_v22 = vunpack.i.h.bf16 %v881_v14  ;;  %v882_v23 = vunpack.i.l.bf16 %v881_v14  ;;  %182 = vmatprep.subr.bf16.mxu0 %v166_v63 }
  0xfc   :  { %183 = vmatpush1.bf16.msra.mxu0 %v165_v4  ;;  %v315_v13 = vsel %vm156_vm9, %v241_v15, %v293_v25  ;;  %v317_v28 = vsel %vm156_vm9, %v249_v12, %v299_v38  ;;  %v240_v30 = vsel %vm1182_vm10, %v239_v16, 0.0  ;;  %v248_v35 = vsel %vm1166_vm7, %v246_v17, 0.0 }
  0xfd   :  { %v278_v36 = vsel %vm77_vm5, %v887_v21, %v888_v20  ;;  %v279_v40 = vsel %vm77_vm5, %v888_v20, %v887_v21  ;;  %v120_v41 = vsel %vm77_vm5, %v882_v23, %v883_v22  ;;  %v121_v25 = vsel %vm77_vm5, %v883_v22, %v882_v23 }
  0xfe   :  { %v896_v42 = vpop.permute.xlu1 %895  ;;  %v891_v38 = vpop.permute.xlu0 %890  ;;  %v323_v43 = vpack.c.bf16 %v317_v28, %v315_v13  ;;  %v314_v45 = vsel %vm156_vm9, %v240_v30, %v292_v26  ;;  %v316_v46 = vsel %vm156_vm9, %v248_v35, %v298_v39  ;;  %v123_v2 = vsel %vm1178_vm8, %v120_v41, 0.0 }
  0xff   :  { %v898_v3 = vunpack.i.h.bf16 %v896_v42  ;;  %v897_v47 = vunpack.i.l.bf16 %v896_v42  ;;  %v893_v48 = vunpack.i.h.bf16 %v891_v38  ;;  %v892_v0 = vunpack.i.l.bf16 %v891_v38 }
 0x100   :  { %334 = vmatprep.subr.bf16.mxu1 %v323_v43  ;;  %v322_v1 = vpack.c.bf16 %v316_v46, %v314_v45  ;;  %v164_v49 = vsel %vm156_vm9, %v123_v2, %v153_v11  ;;  %v281_v50 = vsel %vm1178_vm8, %v278_v36, 0.0  ;;  %v122_v26 = vsel %vm1182_vm10, %v121_v25, 0.0 }
 0x101   :  { %v287_v39 = vsel %vm86_vm4, %v898_v3, %v897_v47  ;;  %v129_v51 = vsel %vm86_vm4, %v893_v48, %v892_v0  ;;  %v168_v54 = vpack.c.bf16 %v164_v49, %v1220_v44  ;;  %v321_v34 = vsel %vm156_vm9, %v281_v50, %v311_v24  ;;  %v376_v49 = vld [vmem:[%s1602_s3] sm:$0xff] }
 0x102   :  { %v289_v11 = vsel %vm1162_vm6, %v287_v39, 0.0  ;;  %v131_v55 = vsel %vm1162_vm6, %v129_v51, 0.0  ;;  %335 = vmatpush1.bf16.msra.mxu1 %v322_v1  ;;  %v325_v56 = vpack.c.bf16 %v321_v34, %v1224_v18  ;;  %v163_v57 = vsel %vm156_vm9, %v122_v26, %v152_v10 }
 0x103   :  { %184 = vmatprep.subr.bf16.mxu0 %v168_v54  ;;  %v167_v44 = vpack.c.bf16 %v163_v57, %v1228_v27  ;;  %v280_v32 = vsel %vm1182_vm10, %v279_v40, 0.0  ;;  %v170_v24 = vpack.c.bf16 %v131_v55, %v131_v55  ;;  %v327_v61 = vpack.c.bf16 %v289_v11, %v289_v11 }
 0x104   :  { %336 = vmatprep.subr.bf16.mxu1 %v325_v56  ;;  %v320_v60 = vsel %vm156_vm9, %v280_v32, %v310_v9  ;;  %v128_v18 = vsel %vm86_vm4, %v892_v0, %v893_v48  ;;  %v286_v33 = vsel %vm86_vm4, %v897_v47, %v898_v3  ;;  %v375_v48 = vld [vmem:[%s1601_s2] sm:$0xff] }
 0x105   :  { %185 = vmatpush1.bf16.msra.mxu0 %v167_v44  ;;  %v324_v10 = vpack.c.bf16 %v320_v60, %v1232_v29  ;;  %v130_v27 = vsel %vm1166_vm7, %v128_v18, 0.0  ;;  %v288_v62 = vsel %vm1166_vm7, %v286_v33, 0.0  ;;  %v44_v29 = vld [vmem:[%s1600_s1] sm:$0xf] }
 0x106   :  { %755 = vmatprep.subr.msk.bf16.mxu0 %vm175_vm11, %v170_v24  ;;  %v169_v31 = vpack.c.bf16 %v130_v27, %v130_v27  ;;  %v326_v9 = vpack.c.bf16 %v288_v62, %v288_v62 }
 0x107   :  { %337 = vmatpush1.bf16.msra.mxu1 %v324_v10 }
 0x108   :  { %757 = vmatprep.subr.msk.bf16.mxu1 %vm175_vm11, %v327_v61  ;;  %v177_v63 = vsel %vm175_vm11, %v169_v31, 0  ;;  %v329_v4 = vsel %vm175_vm11, %v326_v9, 0  ;;  %vm1520_vm11 = vmpackc.low %vm1166_vm7, %vm1016_vm13 }
 0x109   :  { %187 = vmatpush1.bf16.msra.mxu0 %v177_v63 }
 0x10b   :  { %339 = vmatpush1.bf16.msra.mxu1 %v329_v4 }
 0x10c   :  { %756 = vmatmul.mubr.msk.bf16.vlgmr.msra.gmra.mrb[0].mxu0 %vm171_vm12, %v44_v29 }
 0x10d   :  { %548 = vmatprep.mubr.bf16.mxu0 %v1015_v37 }
 0x10e   :  { %758 = vmatmul.mubr.msk.bf16.vlgmr.msra.gmra.mrb[0].mxu1 %vm171_vm12, %v44_v29  ;;  %vm1530_vm12 = vmpackc.low %vm36_vm3, %vm1178_vm8 }
 0x10f   :  { %669 = vmatprep.mubr.bf16.mxu1 %v1015_v37 }
 0x1df   :  { %v216_v5 = vpop.f32.mrb[0].mxu0 }
 0x1e0   :  { %v218_v6 = vpop.f32.mrb[1].mxu0 }
 0x1e1   :  { %v368_v8 = vpop.f32.mrb[0].mxu1  ;;  %v220_v14 = vpop.f32.mrb[2].mxu0  ;;  %v377_v15 = vadd.f32 %v218_v6, %v216_v5 }
 0x1e2   :  { %v370_v12 = vpop.f32.mrb[1].mxu1  ;;  %v221_v16 = vpop.f32.mrb[3].mxu0 }
 0x1e3   :  { %v372_v17 = vpop.f32.mrb[2].mxu1  ;;  %v381_v20 = vadd.f32 %v370_v12, %v368_v8  ;;  %378 = vadd.xlane.f32.xlu0 %v377_v15 }
 0x1e4   :  { %v373_v21 = vpop.f32.mrb[3].mxu1 }
 0x1e5   :  { %382 = vadd.xlane.f32.xlu1 %v381_v20 }
 0x270   :  { %v379_v22 = vpop.xlane.xlu0 %378 }
 0x272   :  { %v383_v23 = vpop.xlane.xlu1 %382 }
 0x273   :  { %v384_v13 = vadd.f32 %v383_v23, %v379_v22 }
 0x275   :  { %v386_v28 = vmul.f32 0.001953125, %v384_v13 }
 0x277   :  { %v387_v30 = vsub.f32 %v216_v5, %v386_v28  ;;  %v388_v35 = vsub.f32 %v218_v6, %v386_v28  ;;  %v395_v36 = vsub.f32 %v368_v8, %v386_v28  ;;  %v396_v37 = vsub.f32 %v370_v12, %v386_v28 }
 0x279   :  { %v389_v40 = vmul.f32 %v387_v30, %v387_v30  ;;  %v390_v41 = vmul.f32 %v388_v35, %v388_v35  ;;  %v397_v25 = vmul.f32 %v395_v36, %v395_v36  ;;  %v398_v42 = vmul.f32 %v396_v37, %v396_v37 }
 0x27b   :  { %v391_v38 = vadd.f32 %v390_v41, %v389_v40  ;;  %v399_v43 = vadd.f32 %v398_v42, %v397_v25 }
 0x27d   :  { %392 = vadd.xlane.f32.xlu0 %v391_v38 }
 0x281   :  { %400 = vadd.xlane.f32.xlu0 %v399_v43 }
 0x30a   :  { %v393_v45 = vpop.xlane.xlu0 %392 }
 0x30e   :  { %v401_v46 = vpop.xlane.xlu0 %400 }
 0x30f   :  { %v402_v2 = vadd.f32 %v401_v46, %v393_v45 }
 0x311   :  { %v403_v3 = vmul.f32 0.001953125, %v402_v2 }
 0x313   :  { %v404_v47 = vadd.f32 1e-05, %v403_v3 }
 0x315   :  { %983 = vrsqrt.f32 %v404_v47 }
 0x31f   :  { %v984_v0 = vpop.eup %983 }
 0x320   :  { %v406_v1 = vmul.f32 %v984_v0, %v375_v48 }
 0x322   :  { %411 = vperm.xlu1 %899, %v406_v1   ;;  %v407_v50 = vmul.f32 %v406_v1, %v386_v28 }
 0x324   :  { %v408_v26 = vsub.f32 %v376_v49, %v407_v50 }
 0x326   :  { %418 = vperm.xlu0 %900, %v408_v26  }
 0x3a1   :  { %v412_v39 = vpop.permute.xlu1 %411 }
 0x3a2   :  { %v414_v51 = vmul.f32 %v412_v39, %v216_v5  ;;  %v415_v54 = vmul.f32 %v412_v39, %v218_v6  ;;  %v425_v34 = vmul.f32 %v412_v39, %v368_v8  ;;  %v426_v11 = vmul.f32 %v412_v39, %v370_v12 }
 0x3a5   :  { %v419_v55 = vpop.permute.xlu0 %418 }
 0x3a6   :  { %v1337_v56 = vadd.f32 %v419_v55, %v414_v51  ;;  %v1339_v57 = vadd.f32 %v419_v55, %v415_v54  ;;  %v1341_v44 = vadd.f32 %v425_v34, %v419_v55  ;;  %v1343_v32 = vadd.f32 %v426_v11, %v419_v55 }
 0x3a8   :  { %v423_v24 = vmax.f32 %v1337_v56, 0.0  ;;  %v424_v60 = vmax.f32 %v1339_v57, 0.0  ;;  %v429_v61 = vmax.f32 %v1341_v44, 0.0  ;;  %v430_v18 = vmax.f32 %v1343_v32, 0.0 }
 0x3aa   :  { %v901_v33 = vpack.i.bf16 %v424_v60, %v423_v24  ;;  %v906_v10 = vpack.i.bf16 %v430_v18, %v429_v61 }
 0x3ac   :  { %902 = vrot.lane.b32.xlu1 %v901_v33, %s1011_s28 }
 0x3b0   :  { %907 = vrot.lane.b32.xlu1 %v906_v10, %s1011_s28 }
 0x3b4   :  { %912 = vrot.lane.b32.xlu1 %v901_v33, %s1012_s29 }
 0x3b8   :  { %917 = vrot.lane.b32.xlu1 %v906_v10, %s1012_s29 }
 0x3bc   :  { %922 = vrot.lane.b32.xlu1 %v901_v33, %s1013_s0 }
 0x3c0   :  { %927 = vrot.lane.b32.xlu1 %v906_v10, %s1013_s0 }
 0x41e   :  { %v903_v27 = vpop.permute.xlu1 %902 }
 0x41f   :  { %v905_v62 = vunpack.i.h.bf16 %v903_v27  ;;  %v904_v31 = vunpack.i.l.bf16 %v903_v27 }
 0x421   :  { %v436_v9 = vsel %vm68_vm0, %v904_v31, %v905_v62  ;;  %v437_v63 = vsel %vm68_vm0, %v905_v62, %v904_v31 }
 0x422   :  { %v908_v4 = vpop.permute.xlu1 %907  ;;  %v438_v29 = vsel %vm33_vm1, %v437_v63, 0.0 }
 0x423   :  { %v910_v5 = vunpack.i.h.bf16 %v908_v4  ;;  %v909_v6 = vunpack.i.l.bf16 %v908_v4  ;;  %v931_v8 = vpack.i.bf16 %v436_v9, %v438_v29 }
 0x425   :  { %932 = vrot.lane.b32.xlu1 %v931_v8, %s1013_s0  ;;  %v1372_v14 = vsel %vm68_vm0, %v909_v6, %v910_v5  ;;  %v1376_v15 = vsel %vm68_vm0, %v910_v5, %v909_v6  ;;  %vm765_vm0 = vmpackc.low %vm1178_vm8, %vm1162_vm6 }
 0x426   :  { %v913_v12 = vpop.permute.xlu1 %912  ;;  %v563_v16 = vsel %vm33_vm1, %v1376_v15, 0.0  ;;  %vm768_vm1 = vmpackc.low %vm1182_vm10, %vm1166_vm7 }
 0x427   :  { %v915_v17 = vunpack.i.h.bf16 %v913_v12  ;;  %v914_v20 = vunpack.i.l.bf16 %v913_v12  ;;  %v946_v21 = vpack.i.bf16 %v1372_v14, %v563_v16 }
 0x429   :  { %947 = vrot.lane.b32.xlu0 %v946_v21, %s1014_s30  ;;  %937 = vrot.lane.b32.xlu1 %v946_v21, %s1013_s0  ;;  %v1386_v22 = vsel %vm111_vm2, %v915_v17, %v914_v20  ;;  %v1390_v30 = vsel %vm111_vm2, %v914_v20, %v915_v17 }
 0x42a   :  { %v918_v23 = vpop.permute.xlu1 %917  ;;  %v479_v35 = vsel %vm36_vm3, %v1386_v22, 0.0 }
 0x42b   :  { %v920_v13 = vunpack.i.h.bf16 %v918_v23  ;;  %v919_v28 = vunpack.i.l.bf16 %v918_v23  ;;  %v961_v37 = vpack.i.bf16 %v479_v35, %v1390_v30 }
 0x42d   :  { %952 = vrot.lane.b32.xlu0 %v901_v33, %s1014_s30  ;;  %942 = vrot.lane.b32.xlu1 %v931_v8, %s1014_s30  ;;  %v1399_v36 = vsel %vm111_vm2, %v920_v13, %v919_v28  ;;  %v1404_v40 = vsel %vm111_vm2, %v919_v28, %v920_v13  ;;  %vm1489_vm2 = vmpackc.low %vm1162_vm6, %vm1016_vm13 }
 0x42e   :  { %v604_v41 = vsel %vm36_vm3, %v1399_v36, 0.0  ;;  %v923_v42 = vpop.permute.xlu1 %922  ;;  %vm780_vm3 = vmpackc.low %vm1016_vm13, %vm1182_vm10 }
 0x42f   :  { %v966_v25 = vpack.i.bf16 %v604_v41, %v1404_v40  ;;  %v925_v55 = vunpack.i.h.bf16 %v923_v42  ;;  %v924_v33 = vunpack.i.l.bf16 %v923_v42 }
 0x431   :  { %962 = vrot.lane.b32.xlu0 %v961_v37, %s1013_s0  ;;  %957 = vrot.lane.b32.xlu1 %v906_v10, %s1014_s30  ;;  %v460_v16 = vsel %vm77_vm5, %v924_v33, %v925_v55  ;;  %v461_v17 = vsel %vm77_vm5, %v925_v55, %v924_v33 }
 0x432   :  { %v928_v38 = vpop.permute.xlu1 %927 }
 0x433   :  { %v930_v48 = vunpack.i.h.bf16 %v928_v38  ;;  %v929_v0 = vunpack.i.l.bf16 %v928_v38 }
 0x435   :  { %972 = vrot.lane.b32.xlu0 %v961_v37, %s1014_s30  ;;  %967 = vrot.lane.b32.xlu1 %v966_v25, %s1013_s0  ;;  %v585_v31 = vsel %vm77_vm5, %v929_v0, %v930_v48 }
 0x439   :  { %977 = vrot.lane.b32.xlu1 %v966_v25, %s1014_s30 }
 0x497   :  { %v933_v43 = vpop.permute.xlu1 %932 }
 0x498   :  { %v935_v45 = vunpack.i.h.bf16 %v933_v43  ;;  %v934_v46 = vunpack.i.l.bf16 %v933_v43 }
 0x49a   :  { %v444_v2 = vsel %vm77_vm5, %v934_v46, %v935_v45  ;;  %v445_v3 = vsel %vm77_vm5, %v935_v45, %v934_v46 }
 0x49b   :  { %v760_v1 = vpack.c.bf16 %v436_v9, %v444_v2  ;;  %v763_v49 = vpack.c.bf16 %v437_v63, %v445_v3  ;;  %v948_v50 = vpop.permute.xlu0 %947  ;;  %v938_v26 = vpop.permute.xlu1 %937 }
 0x49c   :  { %v950_v51 = vunpack.i.h.bf16 %v948_v50  ;;  %v949_v54 = vunpack.i.l.bf16 %v948_v50  ;;  %v940_v34 = vunpack.i.h.bf16 %v938_v26  ;;  %v939_v11 = vunpack.i.l.bf16 %v938_v26 }
 0x49d   :  { %761 = vmatprep.subr.msk.bf16.mxu0 %vm1422_vm14, %v760_v1 }
 0x49e   :  { %v578_v10 = vsel %vm86_vm4, %v950_v51, %v949_v54  ;;  %v569_v27 = vsel %vm77_vm5, %v939_v11, %v940_v34  ;;  %v570_v62 = vsel %vm77_vm5, %v940_v34, %v939_v11  ;;  %764 = vmatpush1.bf16.msk.msra.mxu0 %vm1430_vm15, %v763_v49  ;;  %v577_v20 = vsel %vm86_vm4, %v949_v54, %v950_v51 }
 0x49f   :  { %v786_v9 = vpack.c.bf16 %v1372_v14, %v569_v27  ;;  %v789_v63 = vpack.c.bf16 %v1376_v15, %v570_v62  ;;  %v953_v4 = vpop.permute.xlu0 %952  ;;  %v943_v29 = vpop.permute.xlu1 %942  ;;  %v792_v14 = vpack.c.bf16 %v585_v31, %v578_v10  ;;  %v586_v15 = vsel %vm77_vm5, %v930_v48, %v929_v0 }
 0x4a0   :  { %v955_v5 = vunpack.i.h.bf16 %v953_v4  ;;  %v954_v6 = vunpack.i.l.bf16 %v953_v4  ;;  %v945_v8 = vunpack.i.h.bf16 %v943_v29  ;;  %v944_v12 = vunpack.i.l.bf16 %v943_v29 }
 0x4a1   :  { %787 = vmatprep.subr.msk.bf16.mxu1 %vm1422_vm14, %v786_v9  ;;  %v795_v46 = vpack.c.bf16 %v586_v15, %v577_v20 }
 0x4a2   :  { %v452_v21 = vsel %vm86_vm4, %v944_v12, %v945_v8  ;;  %v453_v23 = vsel %vm86_vm4, %v945_v8, %v944_v12  ;;  %790 = vmatpush1.bf16.msk.msra.mxu1 %vm1430_vm15, %v789_v63  ;;  %v468_v13 = vsel %vm86_vm4, %v954_v6, %v955_v5  ;;  %v469_v28 = vsel %vm86_vm4, %v955_v5, %v954_v6 }
 0x4a3   :  { %v766_v35 = vpack.c.bf16 %v460_v16, %v453_v23  ;;  %v769_v37 = vpack.c.bf16 %v461_v17, %v452_v21  ;;  %v963_v41 = vpop.permute.xlu0 %962  ;;  %v958_v25 = vpop.permute.xlu1 %957  ;;  %793 = vmatprep.subr.msk.bf16.mxu1 %vm765_vm0, %v792_v14  ;;  %v772_v3 = vpack.c.bf16 %v469_v28, %v424_v60  ;;  %v775_v1 = vpack.c.bf16 %v468_v13, %v423_v24 }
 0x4a4   :  { %v965_v42 = vunpack.i.h.bf16 %v963_v41  ;;  %v964_v38 = vunpack.i.l.bf16 %v963_v41  ;;  %v960_v43 = vunpack.i.h.bf16 %v958_v25  ;;  %v959_v45 = vunpack.i.l.bf16 %v958_v25 }
 0x4a5   :  { %767 = vmatprep.subr.msk.bf16.mxu0 %vm765_vm0, %v766_v35 }
 0x4a6   :  { %v484_v47 = vsel %vm77_vm5, %v964_v38, %v965_v42  ;;  %v593_v48 = vsel %vm86_vm4, %v959_v45, %v960_v43  ;;  %v594_v0 = vsel %vm86_vm4, %v960_v43, %v959_v45  ;;  %770 = vmatpush1.bf16.msk.msra.mxu0 %vm768_vm1, %v769_v37  ;;  %796 = vmatpush1.bf16.msk.msra.mxu1 %vm768_vm1, %v795_v46 }
 0x4a7   :  { %v798_v57 = vpack.c.bf16 %v594_v0, %v430_v18  ;;  %v801_v60 = vpack.c.bf16 %v593_v48, %v429_v61  ;;  %v973_v49 = vpop.permute.xlu0 %972  ;;  %v968_v50 = vpop.permute.xlu1 %967  ;;  %773 = vmatprep.subr.msk.bf16.mxu0 %vm1489_vm2, %v772_v3  ;;  %v485_v26 = vsel %vm77_vm5, %v965_v42, %v964_v38  ;;  %v778_v39 = vpack.c.bf16 %v1386_v22, %v484_v47 }
 0x4a8   :  { %v975_v32 = vunpack.i.h.bf16 %v973_v49  ;;  %v974_v24 = vunpack.i.l.bf16 %v973_v49  ;;  %v970_v18 = vunpack.i.h.bf16 %v968_v50  ;;  %v969_v44 = vunpack.i.l.bf16 %v968_v50  ;;  %v679_v50 = vld [vmem:[%s1605_s6] sm:$0xff] }
 0x4a9   :  { %799 = vmatprep.subr.msk.bf16.mxu1 %vm1489_vm2, %v798_v57  ;;  %v781_v10 = vpack.c.bf16 %v1390_v30, %v485_v26  ;;  %v678_v57 = vld [vmem:[%s1604_s5] sm:$0xff]  ;;  %s987_s5 = scalar_lea.vmem %s744_s17, 512 }
 0x4aa   :  { %v492_v51 = vsel %vm86_vm4, %v974_v24, %v975_v32  ;;  %v493_v58 = vsel %vm86_vm4, %v975_v32, %v974_v24  ;;  %v609_v19 = vsel %vm77_vm5, %v969_v44, %v970_v18  ;;  %v610_v54 = vsel %vm77_vm5, %v970_v18, %v969_v44  ;;  %776 = vmatpush1.bf16.msk.msra.mxu0 %vm1520_vm11, %v775_v1  ;;  %p988_p0 = scmp.ne.s32.totalorder %s744_s17, %s987_s5  ;;  %p993_p2 = scmp.lt.s32.totalorder %s987_s5, %s987_s5 }
 0x4ab   :  { %v495_v22 = vsel %vm1162_vm6, %v493_v58, 0.0  ;;  %v804_v34 = vpack.c.bf16 %v1399_v36, %v609_v19  ;;  %v807_v11 = vpack.c.bf16 %v1404_v40, %v610_v54  ;;  %802 = vmatpush1.bf16.msk.msra.mxu1 %vm1520_vm11, %v801_v60  ;;  %v978_v55 = vpop.permute.xlu1 %977  ;;  %779 = vmatprep.subr.msk.bf16.mxu0 %vm1530_vm12, %v778_v39  ;;  %v494_v33 = vsel %vm1166_vm7, %v492_v51, 0.0 }
 0x4ac   :  { %v980_v27 = vunpack.i.h.bf16 %v978_v55  ;;  %v979_v36 = vunpack.i.l.bf16 %v978_v55  ;;  %v505_v62 = vpack.c.bf16 %v495_v22, %v495_v22  ;;  %v504_v40 = vpack.c.bf16 %v494_v33, %v494_v33  ;;  %p994_p3 = por %p993_p2, %p992_p1 }
 0x4ad   :  { %805 = vmatprep.subr.msk.bf16.mxu1 %vm1530_vm12, %v804_v34 }
 0x4ae   :  { %v617_v31 = vsel %vm86_vm4, %v979_v36, %v980_v27  ;;  %v618_v59 = vsel %vm86_vm4, %v980_v27, %v979_v36  ;;  %782 = vmatpush1.bf16.msk.msra.mxu0 %vm780_vm3, %v781_v10  ;;  %v511_v29 = vsel %vm156_vm9, %v504_v40, 0  ;;  %vm506_vm4 = vcmask 588800   ;;  %p995_p4 = pnand %p994_p3, %p988_p0 }
 0x4af   :  { %v620_v9 = vsel %vm1162_vm6, %v618_v59, 0.0  ;;  %808 = vmatpush1.bf16.msk.msra.mxu1 %vm780_vm3, %v807_v11  ;;  %783 = vmatprep.subr.msk.bf16.mxu0 %vm156_vm9, %v505_v62  ;;  %v619_v30 = vsel %vm1166_vm7, %v617_v31, 0.0 }
 0x4b0   :  { %v630_v63 = vpack.c.bf16 %v620_v9, %v620_v9  ;;  %v629_v4 = vpack.c.bf16 %v619_v30, %v619_v30 }
 0x4b2   :  { %525 = vmatpush1.bf16.msra.mxu0 %v511_v29  ;;  %809 = vmatprep.subr.msk.bf16.mxu1 %vm156_vm9, %v630_v63  ;;  %v632_v7 = vsel %vm156_vm9, %v629_v4, 0 }
 0x4b3   :  { %646 = vmatpush1.bf16.msra.mxu1 %v632_v7 }
 0x4b5   :  { %784 = vmatmul.mubr.msk.bf16.vlgmr.msra.gmra.mrb[4].mxu0 %vm506_vm4, %v431_v52 }
 0x4b6   :  { %810 = vmatmul.mubr.msk.bf16.vlgmr.msra.gmra.mrb[4].mxu1 %vm506_vm4, %v431_v52 }
 0x588   :  { %v550_v5 = vpop.f32.mrb[4].mxu0 }
 0x589   :  { %v552_v53 = vpop.f32.mrb[5].mxu0  ;;  %v671_v6 = vpop.f32.mrb[4].mxu1 }
 0x58a   :  { %v554_v8 = vpop.f32.mrb[6].mxu0  ;;  %v673_v12 = vpop.f32.mrb[5].mxu1  ;;  %v680_v16 = vadd.f32 %v552_v53, %v550_v5 }
 0x58b   :  { %v555_v17 = vpop.f32.mrb[7].mxu0  ;;  %v675_v14 = vpop.f32.mrb[6].mxu1  ;;  %v684_v15 = vadd.f32 %v673_v12, %v671_v6 }
 0x58c   :  { %v676_v20 = vpop.f32.mrb[7].mxu1  ;;  %681 = vadd.xlane.f32.xlu0 %v680_v16 }
 0x58d   :  { %685 = vadd.xlane.f32.xlu1 %v684_v15 }
 0x619   :  { %v682_v21 = vpop.xlane.xlu0 %681 }
 0x61a   :  { %v686_v23 = vpop.xlane.xlu1 %685 }
 0x61b   :  { %v687_v13 = vadd.f32 %v686_v23, %v682_v21 }
 0x61d   :  { %v688_v28 = vmul.f32 0.001953125, %v687_v13 }
 0x61f   :  { %v689_v35 = vsub.f32 %v550_v5, %v688_v28  ;;  %v690_v37 = vsub.f32 %v552_v53, %v688_v28  ;;  %v697_v41 = vsub.f32 %v671_v6, %v688_v28  ;;  %v698_v25 = vsub.f32 %v673_v12, %v688_v28 }
 0x621   :  { %v691_v42 = vmul.f32 %v689_v35, %v689_v35  ;;  %v692_v38 = vmul.f32 %v690_v37, %v690_v37  ;;  %v699_v43 = vmul.f32 %v697_v41, %v697_v41  ;;  %v700_v45 = vmul.f32 %v698_v25, %v698_v25 }
 0x623   :  { %v693_v46 = vadd.f32 %v692_v38, %v691_v42  ;;  %v701_v2 = vadd.f32 %v700_v45, %v699_v43 }
 0x625   :  { %694 = vadd.xlane.f32.xlu0 %v693_v46 }
 0x629   :  { %702 = vadd.xlane.f32.xlu0 %v701_v2 }
 0x6b2   :  { %v695_v3 = vpop.xlane.xlu0 %694 }
 0x6b6   :  { %v703_v47 = vpop.xlane.xlu0 %702 }
 0x6b7   :  { %v704_v48 = vadd.f32 %v703_v47, %v695_v3 }
 0x6b9   :  { %v705_v0 = vmul.f32 0.001953125, %v704_v48 }
 0x6bb   :  { %v706_v1 = vadd.f32 1e-05, %v705_v0 }
 0x6bd   :  { %985 = vrsqrt.f32 %v706_v1 }
 0x6c7   :  { %v986_v60 = vpop.eup %985 }
 0x6c8   :  { %v708_v49 = vmul.f32 %v986_v60, %v678_v57 }
 0x6ca   :  { %713 = vperm.xlu1 %899, %v708_v49   ;;  %v709_v56 = vmul.f32 %v708_v49, %v688_v28 }
 0x6cc   :  { %v710_v32 = vsub.f32 %v679_v50, %v709_v56 }
 0x6ce   :  { %720 = vperm.xlu0 %900, %v710_v32  }
 0x749   :  { %v714_v24 = vpop.permute.xlu1 %713 }
 0x74a   :  { %v716_v18 = vmul.f32 %v714_v24, %v550_v5  ;;  %v717_v44 = vmul.f32 %v714_v24, %v552_v53  ;;  %v727_v61 = vmul.f32 %v714_v24, %v671_v6  ;;  %v728_v26 = vmul.f32 %v714_v24, %v673_v12 }
 0x74d   :  { %v721_v39 = vpop.permute.xlu0 %720 }
 0x74e   :  { %v723_v51 = vadd.f32 %v721_v39, %v716_v18  ;;  %v724_v58 = vadd.f32 %v721_v39, %v717_v44  ;;  %v729_v19 = vadd.f32 %v727_v61, %v721_v39  ;;  %v730_v54 = vadd.f32 %v728_v26, %v721_v39 }
 0x750   :  { %v725_v22 = vmax.f32 %v723_v51, 0.0  ;;  %v726_v34 = vmax.f32 %v724_v58, 0.0  ;;  %v731_v11 = vmax.f32 %v729_v19, 0.0  ;;  %v732_v55 = vmax.f32 %v730_v54, 0.0 }
 0x752   :  { %733 = vst [vmem:[#allocation2] sm:$0xff] %v725_v22  ;;  %734 = vst [vmem:[#allocation2 + $0x8] sm:$0xff] %v726_v34 }
 0x753   :  { %736 = vst [vmem:[#allocation2 + $0x10] sm:$0xff] %v731_v11  ;;  %737 = vst [vmem:[#allocation2 + $0x18] sm:$0xff] %v732_v55 }
 0x754   :  { %998 = shalt.err (!%p995_p4)
}
 0x755   :  { %s999_s19 = scalar_lea.hbm %s1606_s7, 512 }
 0x756   :  { %p1000_p5 = scmp.ne.s32.totalorder %s1606_s7, %s999_s19  ;;  %p1003_p6 = scmp.lt.u32.totalorder %s999_s19, %s1606_s7 }
 0x758   :  { %p1005_p7 = pnand %p1003_p6, %p1000_p5 }
 0x75a   :  { %1008 = shalt.err (!%p1005_p7)
}
 0x75b   :  { %s1018_s24 = smov 256  }
 0x75c   :  { %749 = dma.vmem_to_hbm [thread:$0]  %s744_s17, 512, %s1606_s7, [#allocation3], %s1018_s24, %s1018_s24, %s1011_s28  }
 0x75d   :  { %1009 = dma.done.wait [#allocation3], 512  }
 0x75e   :  { %1010 = vsyncadd [#allocation3], 4294966784 }
 0x75f   :  { %753 = vsyncpa [#allocation3], 1 }

</bundles_post_ra>
